<compile_context>
chip_gen: v7x
topology: tpu7x:2x2x1
jax: 0.10.0
libtpu: 0.0.40
codegen_flags: <defaults>
</compile_context>

<pallas_src>
import functools

import jax
import jax.numpy as jnp
from jax.experimental import pallas as pl
from jax.experimental.pallas import tpu as pltpu


def _round_up(x, m):
    return ((x + m - 1) // m) * m


def _pick_tiling(L, halo, max_tile_l):
    """tile_l: multiple of 128; halo_b: multiple of 128, >= halo, divides tile_l."""
    tile_l = min(_round_up(max(L, 1), 128), _round_up(max(max_tile_l, 128), 128))
    tile_l = max(tile_l, _round_up(max(halo, 1), 128))
    halo_b = tile_l
    d = 128
    while d <= tile_l:
        if tile_l % d == 0 and d >= halo:
            halo_b = d
            break
        d += 128
    return tile_l, halo_b


def _make_kernel(K, dilation, padding, C_out, c_split, mode, per_tap):
    """mode: 'fused' (1x1 downsample folded into the matmul), 'sep_ds', 'identity'."""

    def kernel(xa_ref, xb_ref, w_ref, b_ref, *rest):
        if mode == "sep_ds":
            wds_ref, bds_ref, o_ref = rest
        else:
            (o_ref,) = rest

        xa = xa_ref[0]                        # (C_in, TILE_L)   main tile lanes
        xb = xb_ref[0]                        # (C_in, HALO_B)   halo (head of next tile)
        c_in = xa.shape[0]
        tile_l = xa.shape[1]
        halo = dilation * (K - 1)

        # Stitch main + halo ONCE (128-aligned lane concat); every tap is a static
        # lane slice of this slab — no per-tap copies.
        if halo == 0 and padding == 0:
            slab = xa
        else:
            slab = jnp.concatenate([xa, xb], axis=1)   # (C_in, TILE_L + HALO_B)

        def tap(k):
            s = k * dilation
            return slab[:, s:s + tile_l]

        if per_tap:
            # C_in >= 128: K accumulating matmuls, no (K*C_in, TILE_L) slab in VMEM.
            acc = jnp.dot(w_ref[:, 0:c_in], tap(0),
                          preferred_element_type=jnp.float32)
            for k in range(1, K):
                acc = acc + jnp.dot(w_ref[:, k * c_in:(k + 1) * c_in], tap(k),
                                    preferred_element_type=jnp.float32)
        else:
            # C_in < 128: single MXU matmul over the (K*C_in, TILE_L) tap stack.
            rhs = tap(0) if K == 1 else jnp.concatenate(
                [tap(k) for k in range(K)], axis=0)
            acc = jnp.dot(w_ref[...], rhs, preferred_element_type=jnp.float32)
        acc = acc + b_ref[...].astype(jnp.float32)      # (rows,1) lane-broadcast bias

        if mode == "fused":
            conv = jnp.maximum(acc[:c_split], 0.0)      # ReLU (dropout == identity)
            res = acc[c_split:]                         # fused 1x1 downsample rows
        else:
            conv = jnp.maximum(acc, 0.0)
            x_orig = slab[:, padding:padding + tile_l]  # un-padded x for this tile
            if mode == "sep_ds":
                res = jnp.dot(wds_ref[...], x_orig,
                              preferred_element_type=jnp.float32) \
                    + bds_ref[...].astype(jnp.float32)
            else:                                       # identity residual
                res = x_orig.astype(jnp.float32)

        y = jnp.maximum(conv + res, 0.0)                # (>=C_out, TILE_L)
        # Already in PyTorch NCL layout (C_out rows, TILE_L lane-dense columns).
        o_ref[0] = y[:C_out].astype(o_ref.dtype)

    return kernel


def temporal_block(x_ncl, w1, b1, wds, bds, *, kernel_size, stride, dilation,
                   padding, max_tile_l=1024, compute_dtype=None):
    """Forward of TemporalBlock. x_ncl: (N, C_in, L); weights in PyTorch Conv1d layout.

    Returns (N, C_out, L). compute_dtype=jnp.bfloat16 casts the MXU inputs (x, W);
    accumulation stays f32 (recommended on v6e/v7x).
    """
    N, C_in, L = x_ncl.shape
    C_out, _, K = w1.shape
    assert K == kernel_size
    assert stride == 1, "TemporalBlock residual add requires stride == 1"
    halo = dilation * (K - 1)
    assert 2 * padding == halo, (
        "residual add requires conv output length == input length "
        "(2*padding == dilation*(kernel_size-1)); the module has no Chomp1d")
    has_ds = wds is not None
    if not has_ds:
        assert C_in == C_out, "identity residual needs n_inputs == n_outputs"

    # --- tiling (lane axis = L) -------------------------------------------------
    tile_l, halo_b = _pick_tiling(L, max(halo, padding), max_tile_l)
    n_tiles = pl.cdiv(L, tile_l)
    l_tiles = n_tiles * tile_l
    l_in = l_tiles + halo_b
    ratio = tile_l // halo_b

    # --- wrapper-side prep: one contiguous pad along L (no transpose pass) -------
    x_pad = jnp.pad(x_ncl, ((0, 0), (0, 0), (padding, l_in - padding - L)))
    if compute_dtype is not None:
        x_pad = x_pad.astype(compute_dtype)
    w_dtype = x_pad.dtype

    # Conv weight -> (C_out, K*C_in), columns ordered (tap k, c_in).
    w_conv = jnp.transpose(w1, (0, 2, 1)).reshape(C_out, K * C_in).astype(w_dtype)
    b_conv = b1.reshape(C_out, 1).astype(jnp.float32)

    per_tap = C_in >= 128
    fuse_ds = (has_ds and not per_tap
               and padding % dilation == 0 and (padding // dilation) < K)

    extra_inputs, extra_specs = (), ()
    if fuse_ds:
        mode = "fused"
        c_split = _round_up(C_out, 8)          # sublane-aligned conv/residual split
        k0 = padding // dilation               # tap aligned with the un-padded input
        w_c = jnp.zeros((c_split, K * C_in), w_dtype).at[:C_out].set(w_conv)
        w_d = jnp.zeros((c_split, K * C_in), w_dtype)
        w_d = w_d.at[:C_out, k0 * C_in:(k0 + 1) * C_in].set(
            wds[:, :, 0].astype(w_dtype))
        w_big = jnp.concatenate([w_c, w_d], axis=0)                 # (2*c_split, K*C_in)
        b_big = jnp.concatenate(
            [jnp.zeros((c_split, 1), jnp.float32).at[:C_out].set(b_conv),
             jnp.zeros((c_split, 1), jnp.float32).at[:C_out].set(
                 bds.reshape(C_out, 1).astype(jnp.float32))], axis=0)
    else:
        mode = "sep_ds" if has_ds else "identity"
        c_split = C_out
        w_big, b_big = w_conv, b_conv
        if has_ds:
            wds_mat = wds[:, :, 0].astype(w_dtype)                  # (C_out, C_in)
            bds_col = bds.reshape(C_out, 1).astype(jnp.float32)
            extra_inputs = (wds_mat, bds_col)
            extra_specs = (pl.BlockSpec((C_out, C_in), lambda n, i: (0, 0)),
                           pl.BlockSpec((C_out, 1), lambda n, i: (0, 0)))
    rows = w_big.shape[0]

    kernel = _make_kernel(K, dilation, padding, C_out, c_split, mode, per_tap)

    out = pl.pallas_call(
        kernel,
        out_shape=jax.ShapeDtypeStruct((N, C_out, l_tiles), x_ncl.dtype),
        grid=(N, n_tiles),
        in_specs=[
            # main tile: lanes [i*tile_l, (i+1)*tile_l)
            pl.BlockSpec((1, C_in, tile_l), lambda n, i: (n, 0, i)),
            # halo: first halo_b lanes of the *next* tile (second view of same array);
            # weights/bias have constant index maps -> fetched once, not per step.
            pl.BlockSpec((1, C_in, halo_b), lambda n, i: (n, 0, (i + 1) * ratio)),
            pl.BlockSpec((rows, K * C_in), lambda n, i: (0, 0)),
            pl.BlockSpec((rows, 1), lambda n, i: (0, 0)),
            *extra_specs,
        ],
        out_specs=pl.BlockSpec((1, C_out, tile_l), lambda n, i: (n, 0, i)),
        compiler_params=pltpu.CompilerParams(
            dimension_semantics=("parallel", "parallel"),
            # > v5e(16MiB)/v6e(32MiB) scoped defaults, < v7x's 64 MiB physical VMEM.
            vmem_limit_bytes=48 * 1024 * 1024),
    )(x_pad, x_pad, w_big, b_big, *extra_inputs)

    return out if l_tiles == L else out[:, :, :L]


def reference(x, w1, b1, wds, bds, *, stride, dilation, padding):
    dn = ("NCH", "OIH", "NCH")
    out = jax.lax.conv_general_dilated(
        x, w1, window_strides=(stride,), padding=[(padding, padding)],
        rhs_dilation=(dilation,), dimension_numbers=dn)
    out = jnp.maximum(out + b1[None, :, None], 0.0)
    if wds is not None:
        res = jax.lax.conv_general_dilated(
            x, wds, window_strides=(1,), padding=[(0, 0)],
            dimension_numbers=dn) + bds[None, :, None]
    else:
        res = x
    return jnp.maximum(out + res, 0.0)


def run_case(N, C_in, C_out, L, K, dilation, padding, key, *,
             max_tile_l=1024, compute_dtype=None, atol=1e-4, rtol=1e-4):
    k1, k2, k3, k4, k5 = jax.random.split(key, 5)
    x = jax.random.normal(k1, (N, C_in, L), jnp.float32)
    w1 = jax.random.normal(k2, (C_out, C_in, K), jnp.float32) * 0.1
    b1 = jax.random.normal(k3, (C_out,), jnp.float32) * 0.1
    if C_in != C_out:
        wds = jax.random.normal(k4, (C_out, C_in, 1), jnp.float32) * 0.1
        bds = jax.random.normal(k5, (C_out,), jnp.float32) * 0.1
    else:
        wds, bds = None, None
    fn = functools.partial(temporal_block, kernel_size=K, stride=1,
                           dilation=dilation, padding=padding,
                           max_tile_l=max_tile_l, compute_dtype=compute_dtype)
    y = jax.block_until_ready(fn(x, w1, b1, wds, bds))
    if compute_dtype is not None:
        # Compare against a reference computed on the same rounded MXU inputs.
        rnd = lambda a: None if a is None else a.astype(compute_dtype).astype(jnp.float32)
        x_r, w1_r, wds_r = rnd(x), rnd(w1), rnd(wds)
    else:
        x_r, w1_r, wds_r = x, w1, wds
    y_ref = reference(x_r, w1_r, b1, wds_r, bds, stride=1, dilation=dilation,
                      padding=padding)
    assert y.shape == (N, C_out, L), y.shape
    err = jnp.max(jnp.abs(y - y_ref))
    assert jnp.allclose(y, y_ref, atol=atol, rtol=rtol), f"mismatch, max abs err={err}"


if __name__ == "__main__":
    keys = jax.random.split(jax.random.PRNGKey(0), 6)
    # Fused-downsample path, small shapes consistent with the module's forward.
    run_case(N=2, C_in=4, C_out=8, L=16, K=3, dilation=2, padding=2, key=keys[0])
    # Multi-tile: exercises L-tiling + cross-tile halo + trim (3 tiles of 256).
    run_case(N=1, C_in=4, C_out=8, L=640, K=3, dilation=2, padding=2, key=keys[1],
             max_tile_l=256)
    # Identity-residual path (n_inputs == n_outputs).
    run_case(N=1, C_in=8, C_out=8, L=300, K=5, dilation=1, padding=2, key=keys[2])
    # Separate-downsample path (padding not tap-aligned).
    run_case(N=1, C_in=4, C_out=16, L=200, K=2, dilation=2, padding=1, key=keys[3])
    # Per-tap accumulating-matmul path (C_in >= 128).
    run_case(N=1, C_in=128, C_out=8, L=256, K=3, dilation=1, padding=1, key=keys[4])
    # bf16 MXU inputs (f32 accumulation), looser tolerance.
    run_case(N=2, C_in=4, C_out=8, L=16, K=3, dilation=2, padding=2, key=keys[5],
             compute_dtype=jnp.bfloat16, atol=1e-2, rtol=1e-2)

    print("KERNEL_OK")
</pallas_src>

<mosaic_0001>
module attributes {stable_mosaic.version = 11 : i64} {
  func.func @kernel(%arg0: i32, %arg1: i32, %arg2: memref<1x4x128xf32, #tpu.memory_space<vmem>>, %arg3: memref<1x4x128xf32, #tpu.memory_space<vmem>>, %arg4: memref<16x12xf32, #tpu.memory_space<vmem>>, %arg5: memref<16x1xf32, #tpu.memory_space<vmem>>, %arg6: memref<1x8x128xf32, #tpu.memory_space<vmem>>) attributes {dimension_semantics = [#tpu.dimension_semantics<parallel>, #tpu.dimension_semantics<parallel>], iteration_bounds = array<i64: 2, 1>, scalar_prefetch = 0 : i64, scratch_operands = 0 : i64, tpu.core_type = #tpu.core_type<tc>, window_params = [{transform_indices = @transform_0, window_bounds = array<i64: 1, 4, 128>}, {transform_indices = @transform_1, window_bounds = array<i64: 1, 4, 128>}, {pipeline_mode = #tpu.pipeline_mode<synchronous>, transform_indices = @transform_2, window_bounds = array<i64: 16, 12>}, {pipeline_mode = #tpu.pipeline_mode<synchronous>, transform_indices = @transform_3, window_bounds = array<i64: 16, 1>}, {transform_indices = @transform_4, window_bounds = array<i64: 1, 8, 128>}]} {
    %c0 = arith.constant 0 : index
    %c0_0 = arith.constant 0 : index
    %c0_1 = arith.constant 0 : index
    %0 = vector.load %arg2[%c0, %c0_0, %c0_1] : memref<1x4x128xf32, #tpu.memory_space<vmem>>, vector<1x4x128xf32>
    %1 = vector.shape_cast %0 : vector<1x4x128xf32> to vector<4x128xf32>
    %c0_2 = arith.constant 0 : index
    %c0_3 = arith.constant 0 : index
    %c0_4 = arith.constant 0 : index
    %2 = vector.load %arg3[%c0_2, %c0_3, %c0_4] : memref<1x4x128xf32, #tpu.memory_space<vmem>>, vector<1x4x128xf32>
    %3 = vector.shape_cast %2 : vector<1x4x128xf32> to vector<4x128xf32>
    %4 = tpu.concatenate %1, %3 in 1 : vector<4x128xf32>, vector<4x128xf32> -> vector<4x256xf32>
    %5 = vector.extract_strided_slice %4 {offsets = [0, 0], sizes = [4, 128], strides = [1, 1]} : vector<4x256xf32> to vector<4x128xf32>
    %6 = vector.extract_strided_slice %4 {offsets = [0, 2], sizes = [4, 128], strides = [1, 1]} : vector<4x256xf32> to vector<4x128xf32>
    %7 = vector.extract_strided_slice %4 {offsets = [0, 4], sizes = [4, 128], strides = [1, 1]} : vector<4x256xf32> to vector<4x128xf32>
    %8 = tpu.concatenate %5, %6, %7 in 0 : vector<4x128xf32>, vector<4x128xf32>, vector<4x128xf32> -> vector<12x128xf32>
    %c0_5 = arith.constant 0 : index
    %c0_6 = arith.constant 0 : index
    %9 = vector.load %arg4[%c0_5, %c0_6] : memref<16x12xf32, #tpu.memory_space<vmem>>, vector<16x12xf32>
    %cst = arith.constant dense<0.000000e+00> : vector<16x128xf32>
    %10 = tpu.matmul %9, %8, %cst {dimension_numbers = #tpu.dot_dimension_numbers<[1], [0], [0], [1], [0, 0, 1, 1], [], []>} : vector<16x12xf32>, vector<12x128xf32>, vector<16x128xf32> -> vector<16x128xf32>
    %c0_7 = arith.constant 0 : index
    %c0_8 = arith.constant 0 : index
    %11 = vector.load %arg5[%c0_7, %c0_8] : memref<16x1xf32, #tpu.memory_space<vmem>>, vector<16x1xf32>
    %12 = vector.broadcast %11 : vector<16x1xf32> to vector<16x128xf32>
    %13 = arith.addf %10, %12 : vector<16x128xf32>
    %14 = vector.extract_strided_slice %13 {offsets = [0, 0], sizes = [8, 128], strides = [1, 1]} : vector<16x128xf32> to vector<8x128xf32>
    %cst_9 = arith.constant 0.000000e+00 : f32
    %15 = vector.broadcast %cst_9 : f32 to vector<8x128xf32>
    %16 = arith.maximumf %14, %15 : vector<8x128xf32>
    %17 = vector.extract_strided_slice %13 {offsets = [8, 0], sizes = [8, 128], strides = [1, 1]} : vector<16x128xf32> to vector<8x128xf32>
    %18 = arith.addf %16, %17 : vector<8x128xf32>
    %cst_10 = arith.constant 0.000000e+00 : f32
    %19 = vector.broadcast %cst_10 : f32 to vector<8x128xf32>
    %20 = arith.maximumf %18, %19 : vector<8x128xf32>
    %c0_11 = arith.constant 0 : index
    %c0_12 = arith.constant 0 : index
    %c0_13 = arith.constant 0 : index
    %21 = vector.load %arg6[%c0_11, %c0_12, %c0_13] : memref<1x8x128xf32, #tpu.memory_space<vmem>>, vector<1x8x128xf32>
    %22 = vector.shape_cast %21 : vector<1x8x128xf32> to vector<8x128xf32>
    %23 = vector.shape_cast %20 : vector<8x128xf32> to vector<1x8x128xf32>
    tpu.vector_store %arg6[%c0_11, %c0_12, %c0_13], %23 {strides = array<i32>} : memref<1x8x128xf32, #tpu.memory_space<vmem>>, vector<1x8x128xf32>,
    return
  }
  func.func @transform_0(%arg0: i32, %arg1: i32) -> (i32, i32, i32) {
    %c0_i32 = arith.constant 0 : i32
    %c0_i32_0 = arith.constant 0 : i32
    return %arg0, %c0_i32, %arg1 : i32, i32, i32
  }
  func.func @transform_1(%arg0: i32, %arg1: i32) -> (i32, i32, i32) {
    %c1_i32 = arith.constant 1 : i32
    %0 = arith.addi %arg1, %c1_i32 : i32
    %c1_i32_0 = arith.constant 1 : i32
    %1 = arith.muli %0, %c1_i32_0 : i32
    %c0_i32 = arith.constant 0 : i32
    %c0_i32_1 = arith.constant 0 : i32
    return %arg0, %c0_i32, %1 : i32, i32, i32
  }
  func.func @transform_2(%arg0: i32, %arg1: i32) -> (i32, i32) {
    %c0_i32 = arith.constant 0 : i32
    %c0_i32_0 = arith.constant 0 : i32
    %c0_i32_1 = arith.constant 0 : i32
    return %c0_i32, %c0_i32_0 : i32, i32
  }
  func.func @transform_3(%arg0: i32, %arg1: i32) -> (i32, i32) {
    %c0_i32 = arith.constant 0 : i32
    %c0_i32_0 = arith.constant 0 : i32
    %c0_i32_1 = arith.constant 0 : i32
    return %c0_i32, %c0_i32_0 : i32, i32
  }
  func.func @transform_4(%arg0: i32, %arg1: i32) -> (i32, i32, i32) {
    %c0_i32 = arith.constant 0 : i32
    %c0_i32_0 = arith.constant 0 : i32
    return %arg0, %c0_i32, %arg1 : i32, i32, i32
  }
}

</mosaic_0001>

<bundles_post_ra>
// kernel: tpu_custom_call.1
= control target key start
LH: loop header
LB: loop body
LE: loop exit
PB: predicated region body
PF: predicated region fallthrough
CT: control target
= control target key end

     0   :  { %9 = vsyncpa [#allocation3], 0  ;;  %s1062_s0 = inlined_call_operand.vmem [shape: f32[2,4,256], index: 0, kind: input, shape index: {}]   ;;  %s1063_s1 = inlined_call_operand.hbm [shape: f32[2,4,256], index: 1, kind: input, shape index: {}]   ;;  %s1064_s2 = inlined_call_operand.hbm [shape: f32[16,12], index: 2, kind: input, shape index: {}]   ;;  %s1065_s3 = inlined_call_operand.vmem [shape: f32[16,1], index: 3, kind: input, shape index: {}]   ;;  %s1066_s4 = inlined_call_operand.hbm [shape: f32[2,8,128], index: 4, kind: output, shape index: {}]  }
   0x1   :  { %11 = vsyncpa [#allocation3 + $0x1], 0 }
   0x2   :  { %12 = vsyncpa [#allocation6], 0 }
   0x3   :  { %13 = vsyncpa [#allocation4], 0 }
   0x4   :  { %15 = vsyncpa [#allocation4 + $0x1], 0  ;;  %s841_s15 = smov 0   ;;  %s843_s16 = smov 0  }
   0x5   :  { %s845_s17 = smov 0   ;;  %s847_s18 = smov 0  }
   0x6   :  { %s849_s19 = smov 0   ;;  %s851_s20 = smov 0  }
   0x7 LB: > { %s529_s21 = sadd.s32 4294967295, %s805_s20   ;;  %s530_s22 = sadd.s32 4294967294, %s805_s20   ;;  %s805_s20 = sphi %s851_s20, %s21_s20   ;;  %s801_s19 = sphi %s849_s19, %s1089_s19   ;;  %s797_s18 = sphi %s847_s18, %s1088_s18   ;;  %s793_s17 = sphi %s845_s17, %s1087_s17   ;;  %s789_s16 = sphi %s843_s16, %s1086_s16   ;;  %s785_s15 = sphi %s841_s15, %s1085_s15  }
   0x8   : > { %p85_p0 = scmp.ne.s32.totalorder %s789_s16, %s785_s15  ;;  %p875_p1 = scmp.eq.s32.totalorder %s529_s21, 0 }
   0x9   : > { %p879_p2 = scmp.eq.s32.totalorder %s529_s21, 1  ;;  %p159_p3 = scmp.eq.s32.totalorder %s530_s22, 1 }
   0xa   : > { %s1071_s23 = scalar_select %p875_p1, 1, 0 }
   0xb   : > { %s1072_s24 = scalar_select %p879_p2, 1, 0 }
   0xc   : > { %p885_p4 = por %p875_p1, %p85_p0  ;;  %p531_p5 = scmp.ge.s32.totalorder %s805_s20, 1 }
   0xd   : > { %p890_p6 = por %p159_p3, %p85_p0  ;;  %p166_p7 = scmp.lt.s32.totalorder %s805_s20, 3 }
   0xe   : > { %s1073_s25 = scalar_select %p885_p4, 1, 0 }
   0xf   : > { %s1074_s26 = scalar_select %p890_p6, 1, 0 }
  0x10   : > { %p895_p8 = pnand %p531_p5, %p166_p7  ;;  %s807_s28 = smov [#allocation5]  }
  0x11   : > { %s178_s29 = sshll.u32 %s807_s28, 4  ;;  %s33_s5 = sadd.s32 1, %s801_s19  ;;  %s179_s29 = int_to_ptr.vmem [resolvable:$true] %s178_s29 }
  0x12   : > { %s1075_s27 = scalar_select %p895_p8, 1, 0 }
  0x13   : > { %p577_p9 = pneg %p895_p8  ;;  %s660_s8 = scalar_lea.hbm %s1064_s2, 256 }
  0x14   : > { %p661_p12 = scmp.ne.s32.totalorder %s1064_s2, %s660_s8  ;;  %p667_p5 = scmp.lt.u32.totalorder %s660_s8, %s1064_s2 }
  0x15   : > { %p904_p11 = pnand %p577_p9, %p875_p1 }
  0x17   : > { %p662_p13 = pneg %p904_p11 }
  0x19   : > { %p663_p0 = pnand %p662_p13, %p661_p12 }
  0x1b   : > { %p664_p3 = pneg %p663_p0 }
  0x1d   : > { %p669_p7 = pnand %p667_p5, %p664_p3 }
  0x1f   : > { %672 = shalt.err (!%p669_p7)
}
  0x20   : > { %s673_s13 = scalar_lea.vmem %s179_s29, 256  ;;  %p681_p1 = scmp.lt.s32.totalorder %s179_s29, %s179_s29 }
  0x21   : > { %p674_p9 = scmp.ne.s32.totalorder %s179_s29, %s673_s13  ;;  %p682_p4 = scmp.lt.s32.totalorder %s673_s13, %s673_s13 }
  0x23   : > { %p676_p10 = pnand %p674_p9, %p662_p13  ;;  %p683_p8 = por %p682_p4, %p681_p1 }
  0x25   : > { %p677_p6 = pneg %p676_p10 }
  0x27   : > { %p684_p2 = pnand %p683_p8, %p677_p6 }
  0x29   : > { %687 = shalt.err (!%p684_p2)
}
  0x2a   : > { %s808_s14 = smov 128   ;;  %s809_s21 = smov 8  }
  0x2b   : > { %580 = dma.hbm_to_vmem [thread:$0]  (!%p904_p11), %s1064_s2, 256, %s179_s29, [#allocation6], %s808_s14, %s808_s14, %s809_s21  }
  0x2c   : > { %p35_p1 = scmp.ge.s32.totalorder %s33_s5, 2  ;;  %p79_p2 = scmp.ne.s32.totalorder %s793_s17, %s789_s16 }
  0x2d   : > { %p80_p4 = scmp.eq.s32.totalorder %s805_s20, 0  ;;  %s72_s6 = sadd.s32 1, %s793_s17 }
  0x2e   : > { %s1091_s5 = smov (%p35_p1, %s33_s5), 0  ;;  %p1077_p6 = scmp.ne.s32.totalorder %s1072_s24, 0 }
  0x2f   : > { %s67_s8 = ssub.s32 %s801_s19, %s1091_s5  ;;  %p81_p10 = por %p80_p4, %p79_p2 }
  0x30   : > { %p933_p8 = por %p1077_p6, %p79_p2  ;;  %p70_p12 = scmp.eq.s32.totalorder %s67_s8, 0 }
  0x31   : > { %s206_s30 = sand.u32 1, %s793_s17   ;;  %p590_p13 = scmp.lt.s32.totalorder %s805_s20, 2 }
  0x32   : > { %s534_s9 = sshll.u32 %s206_s30, 2  ;;  %s550_s29 = sshll.u32 %s801_s19, 7 }
  0x33   : > { %s942_s10 = scalar_select %p70_p12, %s793_s17, %s72_s6  }
  0x34   : > { %s454_s13 = scalar_lea.hbm %s1063_s1, %s550_s29  ;;  %s210_s14 = scalar_lea.vmem [#allocation2], %s534_s9 }
  0x35   : > { %s220_s21 = sshll.u32 %s210_s14, 4  ;;  %s948_s24 = scalar_lea.hbm %s454_s13, 64  ;;  %s950_s21 = int_to_ptr.vmem [resolvable:$true] %s220_s21 }
  0x36   : > { %p952_p11 = pnand %p590_p13, %p81_p10  ;;  %s207_s28 = scalar_lea.sflag [#allocation3], %s206_s30 }
  0x37   : > { %s718_s6 = scalar_lea.hbm %s454_s13, 128  ;;  %s693_s29 = scalar_lea.hbm %s1063_s1, 256 }
  0x38   : > { %p689_p0 = scmp.ne.s32.totalorder %s948_s24, %s718_s6  ;;  %p690_p3 = pneg %p952_p11 }
  0x39   : > { %p694_p9 = scmp.lt.u32.totalorder %s948_s24, %s1063_s1  ;;  %p695_p1 = scmp.lt.u32.totalorder %s693_s29, %s718_s6 }
  0x3a   : > { %p691_p5 = pnand %p690_p3, %p689_p0  ;;  %p697_p4 = scmp.lt.u32.totalorder %s718_s6, %s948_s24 }
  0x3b   : > { %p696_p2 = por %p695_p1, %p694_p9 }
  0x3c   : > { %p692_p7 = pneg %p691_p5 }
  0x3d   : > { %p698_p6 = por %p697_p4, %p696_p2 }
  0x3f   : > { %p699_p10 = pnand %p698_p6, %p692_p7 }
  0x41   : > { %702 = shalt.err (!%p699_p10)
}
  0x42   : > { %s703_s30 = scalar_lea.vmem %s950_s21, 64  ;;  %s810_s13 = smov [#allocation2]  }
  0x43   : > { %p704_p12 = scmp.ne.s32.totalorder %s950_s21, %s703_s30  ;;  %s708_s14 = sshll.u32 %s810_s13, 4  ;;  %s709_s14 = int_to_ptr.vmem [resolvable:$false] %s708_s14 }
  0x44   : > { %s710_s8 = scalar_lea.vmem %s709_s14, 128  ;;  %p711_p5 = scmp.lt.s32.totalorder %s950_s21, %s709_s14 }
  0x45   : > { %p706_p13 = pnand %p704_p12, %p690_p3  ;;  %p712_p9 = scmp.lt.s32.totalorder %s710_s8, %s703_s30 }
  0x47   : > { %p707_p0 = pneg %p706_p13  ;;  %p713_p1 = por %p712_p9, %p711_p5 }
  0x49   : > { %p714_p2 = pnand %p713_p1, %p707_p0 }
  0x4b   : > { %717 = shalt.err (!%p714_p2)
}
  0x4c   : > { %584 = dma.hbm_to_vmem [thread:$0]  (!%p952_p11), %s948_s24, 64, %s950_s21, %s207_s28  }
  0x4d   : > { %p1080_p7 = scmp.ne.s32.totalorder %s1075_s27, 0 }
  0x4e   : > { %s983_s6 = sand.u32 (!%p1080_p7), 1, %s789_s16   ;;  %p1081_p3 = scmp.ne.s32.totalorder (!%p1080_p7), %s1073_s25, 0 }
  0x4f   : > { %229 = sbr.rel (%p1080_p7) target bundleno = 464 (0x1d0), region = 36  ;;  %s538_s9 = sshll.u32 (!%p1080_p7), %s983_s6, 2 }
  0x50   : > { %s232_s29 = scalar_lea.sflag (!%p1080_p7), [#allocation3], %s983_s6  ;;  %s235_s11 = scalar_lea.vmem (!%p1080_p7), [#allocation2], %s538_s9 }
  0x56   : > { %772 = dma.done.wait (%p1081_p3), %s232_s29, 64  }
  0x57   : > { %774 = vsyncadd (%p1081_p3), %s232_s29, 4294967232  ;;  %p1082_p4 = scmp.ne.s32.totalorder %s1071_s23, 0 }
  0x59   : > { %776 = dma.done.wait (%p1082_p4), [#allocation6], 256  }
  0x5a   : > { %778 = vsyncadd (%p1082_p4), [#allocation6], 4294967040  ;;  %p272_p11 = scmp.lt.s32.totalorder %s797_s18, 1  ;;  %v282_v1 = vld [vmem:[%s235_s11] sm:$0xf]  ;;  %v302_v4 = vld [vmem:[#allocation5] sm:$0xff] }
  0x5b   : > { %v286_v3 = vrot.slane %v282_v1, 4  ;;  %vm316_vm0 = vcmask 97280   ;;  %s811_s23 = smov 126   ;;  %v304_v7 = vld [vmem:[%s1065_s3] sm:$0xff]  ;;  %v812_v8 = vmov 0   ;;  %v305_v9 = vld [vmem:[%s1065_s3 + $0x8] sm:$0xff] }
  0x5c   : > { %s273_s27 = scalar_select %p272_p11, %s797_s18, 1  ;;  %560 = vmatprep.mubr.msk.f32.mxu0 %vm316_vm0, %v302_v4  ;;  %658 = vset.pattern.permute.xlu1 %v812_v8  ;;  %vm291_vm1 = vcmask 1031168   ;;  %vm298_vm2 = vcmask 1014784   ;;  %vm300_vm3 = vcmask 1043456   ;;  %vm814_vm4 = vmmov 1   ;;  %v303_v20 = vld [vmem:[#allocation5 + $0x8] sm:$0xff] }
  0x5d   : > { %659 = vset.pattern.permute.xlu0 %v812_v8  ;;  %308 = vperm.xlu1 %658, %v304_v7   ;;  %s813_s14 = smov 124   ;;  %vm564_vm5 = vmpackc.low %vm300_vm3, %vm814_vm4  ;;  %s540_s8 = sshll.u32 %s983_s6, 3 }
  0x5e   : > { %s551_s21 = sshll.u32 %s273_s27, 3  ;;  %s547_s9 = sshll.u32 %s797_s18, 7 }
  0x5f   : > { %s279_s28 = scalar_lea.vmem %s1062_s0, %s551_s21  ;;  %s271_s29 = scalar_lea.vmem [#allocation7], %s540_s8 }
  0x60   : > { %v281_v0 = vld [vmem:[%s279_s28] sm:$0xf]  ;;  %s419_s11 = sshll.u32 %s271_s29, 4  ;;  %s1013_s24 = scalar_lea.hbm %s1066_s4, %s547_s9  ;;  %s1015_s11 = int_to_ptr.vmem [resolvable:$true] %s419_s11 }
  0x61   : > { %v285_v2 = vrot.slane %v281_v0, 4  ;;  %v653_v6 = vpack.i.bf16 %v282_v1, %v281_v0  ;;  %313 = vperm.xlu1 %658, %v305_v9   ;;  %s405_s22 = scalar_lea.sflag [#allocation4], %s983_s6  ;;  %s719_s28 = scalar_lea.vmem %s1015_s11, 128 }
  0x62   : > { %p720_p6 = scmp.ne.s32.totalorder %s1015_s11, %s719_s28  ;;  %s815_s18 = smov [#allocation7]  }
  0x63   : > { %v648_v5 = vpack.i.bf16 %v286_v3, %v285_v2 }
  0x64   : > { %p721_p10 = pnand %p720_p6, %p933_p8 }
  0x65   : > { %649 = vrot.lane.b32.xlu0 %v648_v5, %s811_s23  ;;  %s723_s23 = sshll.u32 %s815_s18, 4  ;;  %s724_s23 = int_to_ptr.vmem [resolvable:$false] %s723_s23 }
  0x66   : > { %p722_p12 = pneg %p721_p10  ;;  %s725_s25 = scalar_lea.vmem %s724_s23, 256 }
  0x67   : > { %p726_p13 = scmp.lt.s32.totalorder %s1015_s11, %s724_s23  ;;  %p727_p0 = scmp.lt.s32.totalorder %s725_s25, %s719_s28 }
  0x69   : > { %654 = vrot.lane.b32.xlu0 %v653_v6, %s813_s14  ;;  %p728_p5 = por %p727_p0, %p726_p13 }
  0x6b   : > { %p729_p9 = pnand %p728_p5, %p722_p12 }
  0xd7   : > { %v650_v10 = vpop.permute.xlu0 %649 }
  0xd8   : > { %v652_v11 = vunpack.i.h.bf16 %v650_v10  ;;  %v651_v12 = vunpack.i.l.bf16 %v650_v10 }
  0xda   : > { %v292_v14 = vsel %vm291_vm1, %v651_v12, %v652_v11 }
  0xdb   : > { %v655_v13 = vpop.permute.xlu0 %654  ;;  %v301_v18 = vsel %vm300_vm3, %v281_v0, %v292_v14 }
  0xdc   : > { %v657_v15 = vunpack.i.h.bf16 %v655_v13  ;;  %v656_v16 = vunpack.i.l.bf16 %v655_v13  ;;  %v309_v21 = vpop.permute.xlu1 %308 }
  0xde   : > { %v299_v17 = vsel %vm298_vm2, %v656_v16, %v657_v15 }
  0xdf   : > { %v563_v19 = vpack.c.bf16 %v299_v17, %v301_v18 }
  0xe0   : > { %v314_v23 = vpop.permute.xlu1 %313 }
  0xe1   : > { %565 = vmatprep.subr.msk.bf16.mxu0 %vm564_vm5, %v563_v19 }
  0xe2   : > { %568 = vmatpush3.bf16.msk.msra.mxu0 %vm564_vm5, %v563_v19 }
  0xe5   : > { %561 = vmatmul.mubr.msk.f32.vlgmr.msra.gmra.mrb[0].mxu0 %vm316_vm0, %v303_v20 }
 0x1b8   : > { %v562_v22 = vpop.f32.mrb[0].mxu0 }
 0x1b9   : > { %v391_v24 = vpop.f32.mrb[1].mxu0  ;;  %v397_v26 = vadd.f32 %v562_v22, %v314_v23 }
 0x1ba   : > { %v392_v25 = vadd.f32 %v391_v24, %v309_v21 }
 0x1bc   : > { %v400_v27 = vmax.f32 %v392_v25, 0.0 }
 0x1be   : > { %v401_v28 = vadd.f32 %v400_v27, %v397_v26 }
 0x1c0   : > { %v402_v29 = vmax.f32 %v401_v28, 0.0 }
 0x1c2   : > { %403 = vst [vmem:[%s271_s29] sm:$0xff] %v402_v29 }
 0x1c3   : > { %732 = shalt.err (!%p729_p9)
}
 0x1c4   : > { %s733_s6 = scalar_lea.hbm %s1013_s24, 128  ;;  %s737_s13 = scalar_lea.hbm %s1066_s4, 256 }
 0x1c5   : > { %p734_p1 = scmp.ne.s32.totalorder %s1013_s24, %s733_s6  ;;  %p738_p3 = scmp.lt.u32.totalorder %s1013_s24, %s1066_s4 }
 0x1c6   : > { %p739_p4 = scmp.lt.u32.totalorder %s737_s13, %s733_s6  ;;  %p741_p6 = scmp.lt.u32.totalorder %s733_s6, %s1013_s24 }
 0x1c7   : > { %p735_p2 = pnand %p734_p1, %p933_p8 }
 0x1c8   : > { %p740_p11 = por %p739_p4, %p738_p3 }
 0x1c9   : > { %p736_p7 = pneg %p735_p2 }
 0x1ca   : > { %p742_p10 = por %p741_p6, %p740_p11 }
 0x1cc   : > { %p743_p12 = pnand %p742_p10, %p736_p7 }
 0x1ce   : > { %746 = shalt.err (!%p743_p12)
}
 0x1cf   : > { %575 = dma.vmem_to_hbm [thread:$0]  (%p933_p8), %s1015_s11, 128, %s1013_s24, %s405_s22  }
 0x1d0 PF: > { %s431_s9 = sand.u32 1, %s785_s15   ;;  %p1083_p13 = scmp.ne.s32.totalorder %s1074_s26, 0 }
 0x1d1   : > { %p1084_p0 = scmp.ge.s32.totalorder %s805_s20, 2  ;;  %s432_s29 = scalar_lea.sflag [#allocation4], %s431_s9 }
 0x1d3   : > { %p586_p5 = pnand %p1084_p0, %p1083_p13 }
 0x1d5   : > { %780 = dma.done.wait (!%p586_p5), %s432_s29, 128  }
 0x1d6   : > { %782 = vsyncadd (!%p586_p5), %s432_s29, 4294967168  ;;  %s21_s20 = sadd.s32 1, %s805_s20   ;;  %s1085_s15 = smov %s789_s16 }
 0x1d7   : > { %p18_p9 = scmp.ge.s32.totalorder %s21_s20, 4   ;;  %s1086_s16 = smov %s793_s17 }
 0x1d8   : > { %s1087_s17 = smov %s942_s10  ;;  %s1088_s18 = smov %s801_s19 }
 0x1d9   : > { %s1089_s19 = smov %s1091_s5  ;;  %20 = sbr.rel (!%p18_p9) target bundleno = 7 (0x7), region = 88 }
 0x1e0   :  { %437 = vsyncpa [#allocation3], 1 }
 0x1e1   :  { %439 = vsyncpa [#allocation3 + $0x1], 1 }
 0x1e2   :  { %440 = vsyncpa [#allocation6], 1 }
 0x1e3   :  { %441 = vsyncpa [#allocation4], 1 }
 0x1e4   :  { %443 = vsyncpa [#allocation4 + $0x1], 1 }

</bundles_post_ra>
